<compile_context>
chip_gen: v6e
topology: v6e:2x2x1
jax: 0.10.0
libtpu: 0.0.40
codegen_flags: <defaults>
</compile_context>

<pallas_src>
import functools

import jax
import jax.numpy as jnp
from jax.experimental import pallas as pl
from jax.experimental.pallas import tpu as pltpu


def _round_up(x, mult):
    return ((x + mult - 1) // mult) * mult


def _cdiv(a, b):
    return (a + b - 1) // b


def _symrelu(x, b):
    # SymReLU(x, b) = relu(x - b) - relu(-x - b); b broadcasts over rows.
    return jnp.maximum(x - b, 0.0) - jnp.maximum(-x - b, 0.0)


def _sparse_contrastive_kernel(
    x1_ref, x2_ref, wo_ref, wt_ref, bo2_ref, bt2_ref,   # inputs
    partial_ref,                                        # output: (8, 128) per chunk
    acc_ref,                                            # scratch: (8, 128) f32
    *, n_total, tile_n, tiles_per_chunk,
):
    c = pl.program_id(0)          # "parallel" chunk axis (v7x megacore)
    i = pl.program_id(1)          # "arbitrary" accumulation axis within chunk

    @pl.when(i == 0)
    def _():
        acc_ref[...] = jnp.zeros_like(acc_ref)

    # Linear layers on the MXU (bf16 or f32 inputs, f32 accumulation).
    # Bias is folded into the SymReLU algebra:
    #   SymReLU(xW + b, b) == relu(xW) - relu(-xW - 2b)
    # so there is no post-matmul bias add and no (tile_n, m) bias broadcast.
    yo = jnp.dot(x1_ref[...], wo_ref[...], preferred_element_type=jnp.float32)
    yt = jnp.dot(x2_ref[...], wt_ref[...], preferred_element_type=jnp.float32)

    two_bo = bo2_ref[...]         # (1, m) f32, implicit sublane broadcast below
    two_bt = bt2_ref[...]
    zo = jnp.maximum(yo, 0.0) - jnp.maximum(-yo - two_bo, 0.0)
    zt = jnp.maximum(yt, 0.0) - jnp.maximum(-yt - two_bt, 0.0)

    # F.normalize(z, dim=1): z / max(||z||, 1e-12) == z * min(rsqrt(ss), 1e12).
    # rsqrt runs on the EUP (its own bundle slot); the clamp also turns
    # rsqrt(0)=inf into a finite value so all-zero rows contribute exactly 0.
    inv_o = jnp.minimum(jax.lax.rsqrt(jnp.sum(zo * zo, axis=1, keepdims=True)),
                        jnp.float32(1e12))
    inv_t = jnp.minimum(jax.lax.rsqrt(jnp.sum(zt * zt, axis=1, keepdims=True)),
                        jnp.float32(1e12))

    # Per-row dot products (XLU lane reduce, otherwise-idle slot), scaled by
    # both inverse norms and the valid-row mask (zero-padded ragged tile),
    # reduced to one scalar per step.  No full-tile accumulator RMW: the
    # running sum lives in a single-vreg (8, 128) VMEM accumulator that gets
    # a scalar splat-add each step.
    row_dot = jnp.sum(zo * zt, axis=1, keepdims=True)                 # (tile_n, 1)
    row0 = (c * tiles_per_chunk + i) * tile_n
    rows = jax.lax.broadcasted_iota(jnp.int32, (tile_n, 1), 0) + row0
    valid = (rows < n_total).astype(jnp.float32)
    step_sum = jnp.sum(row_dot * (inv_o * inv_t * valid))             # scalar

    acc_ref[...] += step_sum

    # Epilogue: every element of acc_ref equals the chunk partial sum; write
    # it to an aligned, lane-dense (8, 128) output block.
    @pl.when(i == pl.num_programs(1) - 1)
    def _():
        partial_ref[...] = acc_ref[...]


def sparse_contrastive_loss(
    x1, x2, wo, wt, bo, bt, *,
    tile_n=1024,                   # large batch tiles amortize per-step overhead
    num_chunks=1,                  # 1 on v5e/v6e (single TC); 2 on v7x (2 TCs)
    compute_dtype=jnp.bfloat16,    # matmul-input dtype; use jnp.float32 for exact parity
    weight_buffers=None,           # e.g. 1 on v7x: single-buffer the resident W/b
    x_buffers=None,                # e.g. 3: deeper pipeline for the streamed x tiles
):
    """x1, x2: (N, p). wo, wt: (p, m) pre-transposed Linear weights. bo, bt: (m,).

    Returns the scalar contrastive loss 2 - 2 * mean(cos(zo, zt))."""
    n, p = x1.shape
    m = wo.shape[1]

    tile_n = min(tile_n, _round_up(n, 8))          # multiple of 8 sublanes
    total_tiles = _cdiv(n, tile_n)
    tiles_per_chunk = _cdiv(total_tiles, num_chunks)
    n_pad = num_chunks * tiles_per_chunk * tile_n

    # Matmul inputs in compute_dtype (bf16 halves the streamed HBM bytes of
    # the dominant x1/x2 inputs; the MXU accumulates in f32 either way).
    # No padding of p or m — the BlockSpecs below use the full feature dims —
    # so the only wrapper-side work is the dtype cast plus at most a few zero
    # rows for the ragged last batch tile (masked in-kernel).
    x1c = x1.astype(compute_dtype)
    x2c = x2.astype(compute_dtype)
    if n_pad != n:
        x1c = jnp.pad(x1c, ((0, n_pad - n), (0, 0)))
        x2c = jnp.pad(x2c, ((0, n_pad - n), (0, 0)))
    woc = wo.astype(compute_dtype)
    wtc = wt.astype(compute_dtype)
    bo2 = (2.0 * bo.astype(jnp.float32)).reshape(1, m)   # 2b, used by the folded SymReLU
    bt2 = (2.0 * bt.astype(jnp.float32)).reshape(1, m)

    kernel = functools.partial(
        _sparse_contrastive_kernel,
        n_total=n, tile_n=tile_n, tiles_per_chunk=tiles_per_chunk,
    )

    def _spec(shape, index_map, buffers=None):
        if buffers is None:
            return pl.BlockSpec(shape, index_map)
        return pl.BlockSpec(shape, index_map, pipeline_mode=pl.Buffered(buffers))

    x_map = lambda c, i: (c * tiles_per_chunk + i, 0)
    const_map = lambda c, i: (0, 0)

    # NOTE: Wo/Wt/2bo/2bt have constant block indices so they are DMA'd once
    # and stay VMEM-resident; on v7x (64 MiB VMEM) pass weight_buffers=1 to
    # drop their dead second pipeline buffer.
    # TODO(synk): for very large p*m the weights should instead be K-tiled
    # over p (third "arbitrary" grid axis + f32 accumulator) to stay VMEM-safe.
    partials = pl.pallas_call(
        kernel,
        out_shape=jax.ShapeDtypeStruct((num_chunks * 8, 128), jnp.float32),
        grid_spec=pltpu.PrefetchScalarGridSpec(
            num_scalar_prefetch=0,
            grid=(num_chunks, tiles_per_chunk),
            in_specs=[
                _spec((tile_n, p), x_map, x_buffers),       # x1 tile
                _spec((tile_n, p), x_map, x_buffers),       # x2 tile
                _spec((p, m), const_map, weight_buffers),   # Wo (resident)
                _spec((p, m), const_map, weight_buffers),   # Wt (resident)
                _spec((1, m), const_map, weight_buffers),   # 2*bo
                _spec((1, m), const_map, weight_buffers),   # 2*bt
            ],
            out_specs=pl.BlockSpec((8, 128), lambda c, i: (c, 0)),
            scratch_shapes=[pltpu.VMEM((8, 128), jnp.float32)],
        ),
        compiler_params=pltpu.CompilerParams(
            dimension_semantics=("parallel", "arbitrary"),
        ),
    )(x1c, x2c, woc, wtc, bo2, bt2)

    # Each chunk wrote its partial sum broadcast over one (8, 128) block.
    chunk_sums = partials.reshape(num_chunks, 8, 128)[:, 0, 0]
    return 2.0 - 2.0 * jnp.sum(chunk_sums) / jnp.float32(n)


def _reference_loss(x1, x2, wo, wt, bo, bt):
    zo = x1 @ wo + bo
    zt = x2 @ wt + bt
    zo = _symrelu(zo, bo)
    zt = _symrelu(zt, bt)
    zo = zo / jnp.maximum(jnp.linalg.norm(zo, axis=1, keepdims=True), 1e-12)
    zt = zt / jnp.maximum(jnp.linalg.norm(zt, axis=1, keepdims=True), 1e-12)
    return 2.0 - 2.0 * jnp.mean(jnp.sum(zo * zt, axis=1))


if __name__ == "__main__":
    # Small, module-consistent shapes: batch N=48, input dim p=32, latent m=32.
    N, p, m = 48, 32, 32
    key = jax.random.PRNGKey(0)
    k1, k2, k3, k4, k5, k6 = jax.random.split(key, 6)

    x1 = jax.random.normal(k1, (N, p), dtype=jnp.float32)
    x2 = jax.random.normal(k2, (N, p), dtype=jnp.float32)

    # Deterministic parameter init (Wo_init / Wt_init analogues), stored (p, m).
    wo = jax.random.normal(k3, (p, m), dtype=jnp.float32) * 0.1
    wt = jax.random.normal(k4, (p, m), dtype=jnp.float32) * 0.1
    bo = jax.random.uniform(k5, (m,), dtype=jnp.float32) * 0.05
    bt = jax.random.uniform(k6, (m,), dtype=jnp.float32) * 0.05

    ref = _reference_loss(x1, x2, wo, wt, bo, bt)

    # Exact-parity config: f32 matmul inputs, single chunk, big (capped) tile.
    loss_f32 = jax.block_until_ready(
        sparse_contrastive_loss(x1, x2, wo, wt, bo, bt, compute_dtype=jnp.float32))
    assert jnp.allclose(loss_f32, ref, atol=1e-4, rtol=1e-4), (loss_f32, ref)

    # Fast default: bf16 matmul inputs (f32 MXU accumulation & elementwise).
    loss_bf16 = jax.block_until_ready(
        sparse_contrastive_loss(x1, x2, wo, wt, bo, bt))
    assert jnp.allclose(loss_bf16, ref, atol=5e-3, rtol=5e-3), (loss_bf16, ref)

    # Small-tile, 2-chunk config: exercises the inner accumulation axis,
    # the ragged-tile row mask and the per-chunk partial combine.
    loss_sm = jax.block_until_ready(
        sparse_contrastive_loss(x1, x2, wo, wt, bo, bt,
                                tile_n=16, num_chunks=2,
                                compute_dtype=jnp.float32))
    assert jnp.allclose(loss_sm, ref, atol=1e-4, rtol=1e-4), (loss_sm, ref)

    print("KERNEL_OK")
</pallas_src>

<mosaic_0001>
module attributes {stable_mosaic.version = 11 : i64} {
  func.func @_sparse_contrastive_kernel(%arg0: i32, %arg1: i32, %arg2: memref<48x32xf32, #tpu.memory_space<vmem>>, %arg3: memref<48x32xf32, #tpu.memory_space<vmem>>, %arg4: memref<32x32xf32, #tpu.memory_space<vmem>>, %arg5: memref<32x32xf32, #tpu.memory_space<vmem>>, %arg6: memref<1x32xf32, #tpu.memory_space<vmem>>, %arg7: memref<1x32xf32, #tpu.memory_space<vmem>>, %arg8: memref<8x128xf32, #tpu.memory_space<vmem>>, %arg9: memref<8x128xf32, #tpu.memory_space<vmem>>) attributes {dimension_semantics = [#tpu.dimension_semantics<parallel>, #tpu.dimension_semantics<arbitrary>], iteration_bounds = array<i64: 1, 1>, scalar_prefetch = 0 : i64, scratch_operands = 1 : i64, tpu.core_type = #tpu.core_type<tc>, window_params = [{transform_indices = @transform_0, window_bounds = array<i64: 48, 32>}, {transform_indices = @transform_1, window_bounds = array<i64: 48, 32>}, {pipeline_mode = #tpu.pipeline_mode<synchronous>, transform_indices = @transform_2, window_bounds = array<i64: 32, 32>}, {pipeline_mode = #tpu.pipeline_mode<synchronous>, transform_indices = @transform_3, window_bounds = array<i64: 32, 32>}, {pipeline_mode = #tpu.pipeline_mode<synchronous>, transform_indices = @transform_4, window_bounds = array<i64: 1, 32>}, {pipeline_mode = #tpu.pipeline_mode<synchronous>, transform_indices = @transform_5, window_bounds = array<i64: 1, 32>}, {transform_indices = @transform_6, window_bounds = array<i64: 8, 128>}]} {
    %c0_i32 = arith.constant 0 : i32
    %0 = arith.cmpi eq, %arg1, %c0_i32 : i32
    %1 = arith.extui %0 : i1 to i32
    %c0_i32_0 = arith.constant 0 : i32
    %2 = arith.cmpi ne, %1, %c0_i32_0 : i32
    scf.if %2 {
      %cst_32 = arith.constant 0.000000e+00 : f32
      %68 = vector.broadcast %cst_32 : f32 to vector<8x128xf32>
      %c0_33 = arith.constant 0 : index
      %c0_34 = arith.constant 0 : index
      %69 = vector.load %arg9[%c0_33, %c0_34] : memref<8x128xf32, #tpu.memory_space<vmem>>, vector<8x128xf32>
      tpu.vector_store %arg9[%c0_33, %c0_34], %68 {strides = array<i32>} : memref<8x128xf32, #tpu.memory_space<vmem>>, vector<8x128xf32>,
    } else {
    }
    %c0 = arith.constant 0 : index
    %c0_1 = arith.constant 0 : index
    %3 = vector.load %arg2[%c0, %c0_1] : memref<48x32xf32, #tpu.memory_space<vmem>>, vector<48x32xf32>
    %c0_2 = arith.constant 0 : index
    %c0_3 = arith.constant 0 : index
    %4 = vector.load %arg4[%c0_2, %c0_3] : memref<32x32xf32, #tpu.memory_space<vmem>>, vector<32x32xf32>
    %cst = arith.constant dense<0.000000e+00> : vector<48x32xf32>
    %5 = tpu.matmul %3, %4, %cst {dimension_numbers = #tpu.dot_dimension_numbers<[1], [0], [0], [1], [0, 0, 1, 1], [], []>} : vector<48x32xf32>, vector<32x32xf32>, vector<48x32xf32> -> vector<48x32xf32>
    %c0_4 = arith.constant 0 : index
    %c0_5 = arith.constant 0 : index
    %6 = vector.load %arg3[%c0_4, %c0_5] : memref<48x32xf32, #tpu.memory_space<vmem>>, vector<48x32xf32>
    %c0_6 = arith.constant 0 : index
    %c0_7 = arith.constant 0 : index
    %7 = vector.load %arg5[%c0_6, %c0_7] : memref<32x32xf32, #tpu.memory_space<vmem>>, vector<32x32xf32>
    %cst_8 = arith.constant dense<0.000000e+00> : vector<48x32xf32>
    %8 = tpu.matmul %6, %7, %cst_8 {dimension_numbers = #tpu.dot_dimension_numbers<[1], [0], [0], [1], [0, 0, 1, 1], [], []>} : vector<48x32xf32>, vector<32x32xf32>, vector<48x32xf32> -> vector<48x32xf32>
    %c0_9 = arith.constant 0 : index
    %c0_10 = arith.constant 0 : index
    %9 = vector.load %arg6[%c0_9, %c0_10] : memref<1x32xf32, #tpu.memory_space<vmem>>, vector<1x32xf32>
    %c0_11 = arith.constant 0 : index
    %c0_12 = arith.constant 0 : index
    %10 = vector.load %arg7[%c0_11, %c0_12] : memref<1x32xf32, #tpu.memory_space<vmem>>, vector<1x32xf32>
    %cst_13 = arith.constant 0.000000e+00 : f32
    %11 = vector.broadcast %cst_13 : f32 to vector<48x32xf32>
    %12 = arith.maximumf %5, %11 : vector<48x32xf32>
    %cst_14 = arith.constant 0.000000e+00 : f32
    %13 = vector.broadcast %cst_14 : f32 to vector<48x32xf32>
    %14 = arith.subf %13, %5 : vector<48x32xf32>
    %15 = vector.broadcast %9 : vector<1x32xf32> to vector<48x32xf32>
    %16 = arith.subf %14, %15 : vector<48x32xf32>
    %cst_15 = arith.constant 0.000000e+00 : f32
    %17 = vector.broadcast %cst_15 : f32 to vector<48x32xf32>
    %18 = arith.maximumf %16, %17 : vector<48x32xf32>
    %19 = arith.subf %12, %18 : vector<48x32xf32>
    %cst_16 = arith.constant 0.000000e+00 : f32
    %20 = vector.broadcast %cst_16 : f32 to vector<48x32xf32>
    %21 = arith.maximumf %8, %20 : vector<48x32xf32>
    %cst_17 = arith.constant 0.000000e+00 : f32
    %22 = vector.broadcast %cst_17 : f32 to vector<48x32xf32>
    %23 = arith.subf %22, %8 : vector<48x32xf32>
    %24 = vector.broadcast %10 : vector<1x32xf32> to vector<48x32xf32>
    %25 = arith.subf %23, %24 : vector<48x32xf32>
    %cst_18 = arith.constant 0.000000e+00 : f32
    %26 = vector.broadcast %cst_18 : f32 to vector<48x32xf32>
    %27 = arith.maximumf %25, %26 : vector<48x32xf32>
    %28 = arith.subf %21, %27 : vector<48x32xf32>
    %29 = arith.mulf %19, %19 : vector<48x32xf32>
    %cst_19 = arith.constant dense<0.000000e+00> : vector<48xf32>
    %30 = vector.multi_reduction <add>, %29, %cst_19 [1] : vector<48x32xf32> to vector<48xf32>
    %31 = vector.shape_cast %30 : vector<48xf32> to vector<48x1xf32>
    %32 = math.rsqrt %31 : vector<48x1xf32>
    %cst_20 = arith.constant 9.99999995E+11 : f32
    %33 = vector.broadcast %cst_20 : f32 to vector<48x1xf32>
    %34 = arith.minimumf %32, %33 : vector<48x1xf32>
    %35 = arith.mulf %28, %28 : vector<48x32xf32>
    %cst_21 = arith.constant dense<0.000000e+00> : vector<48xf32>
    %36 = vector.multi_reduction <add>, %35, %cst_21 [1] : vector<48x32xf32> to vector<48xf32>
    %37 = vector.shape_cast %36 : vector<48xf32> to vector<48x1xf32>
    %38 = math.rsqrt %37 : vector<48x1xf32>
    %cst_22 = arith.constant 9.99999995E+11 : f32
    %39 = vector.broadcast %cst_22 : f32 to vector<48x1xf32>
    %40 = arith.minimumf %38, %39 : vector<48x1xf32>
    %41 = arith.mulf %19, %28 : vector<48x32xf32>
    %cst_23 = arith.constant dense<0.000000e+00> : vector<48xf32>
    %42 = vector.multi_reduction <add>, %41, %cst_23 [1] : vector<48x32xf32> to vector<48xf32>
    %43 = vector.shape_cast %42 : vector<48xf32> to vector<48x1xf32>
    %c1_i32 = arith.constant 1 : i32
    %44 = arith.muli %arg0, %c1_i32 : i32
    %45 = arith.addi %44, %arg1 : i32
    %c48_i32 = arith.constant 48 : i32
    %46 = arith.muli %45, %c48_i32 : i32
    %47 = tpu.iota {dimensions = array<i32: 0>} : vector<48x1xi32>
    %48 = vector.broadcast %46 : i32 to vector<48x1xi32>
    %49 = arith.addi %47, %48 : vector<48x1xi32>
    %c48_i32_24 = arith.constant 48 : i32
    %50 = vector.broadcast %c48_i32_24 : i32 to vector<48x1xi32>
    %51 = arith.cmpi slt, %49, %50 : vector<48x1xi32>
    %52 = arith.extui %51 : vector<48x1xi1> to vector<48x1xi32>
    %53 = arith.sitofp %52 : vector<48x1xi32> to vector<48x1xf32>
    %54 = arith.mulf %34, %40 : vector<48x1xf32>
    %55 = arith.mulf %54, %53 : vector<48x1xf32>
    %56 = arith.mulf %43, %55 : vector<48x1xf32>
    %57 = vector.shape_cast %56 : vector<48x1xf32> to vector<1x48x1xf32>
    %cst_25 = arith.constant dense<0.000000e+00> : vector<1xf32>
    %58 = vector.multi_reduction <add>, %57, %cst_25 [1, 2] : vector<1x48x1xf32> to vector<1xf32>
    %59 = vector.shape_cast %58 : vector<1xf32> to vector<1x1x1xf32>
    %60 = vector.extract %59[0, 0, 0] : f32 from vector<1x1x1xf32>
    %c0_26 = arith.constant 0 : index
    %c0_27 = arith.constant 0 : index
    %61 = vector.load %arg9[%c0_26, %c0_27] : memref<8x128xf32, #tpu.memory_space<vmem>>, vector<8x128xf32>
    %62 = vector.broadcast %60 : f32 to vector<8x128xf32>
    %63 = arith.addf %61, %62 : vector<8x128xf32>
    %c0_28 = arith.constant 0 : index
    %c0_29 = arith.constant 0 : index
    %64 = vector.load %arg9[%c0_28, %c0_29] : memref<8x128xf32, #tpu.memory_space<vmem>>, vector<8x128xf32>
    tpu.vector_store %arg9[%c0_28, %c0_29], %63 {strides = array<i32>} : memref<8x128xf32, #tpu.memory_space<vmem>>, vector<8x128xf32>,
    %c0_i32_30 = arith.constant 0 : i32
    %65 = arith.cmpi eq, %arg1, %c0_i32_30 : i32
    %66 = arith.extui %65 : i1 to i32
    %c0_i32_31 = arith.constant 0 : i32
    %67 = arith.cmpi ne, %66, %c0_i32_31 : i32
    scf.if %67 {
      %c0_32 = arith.constant 0 : index
      %c0_33 = arith.constant 0 : index
      %68 = vector.load %arg9[%c0_32, %c0_33] : memref<8x128xf32, #tpu.memory_space<vmem>>, vector<8x128xf32>
      %c0_34 = arith.constant 0 : index
      %c0_35 = arith.constant 0 : index
      %69 = vector.load %arg8[%c0_34, %c0_35] : memref<8x128xf32, #tpu.memory_space<vmem>>, vector<8x128xf32>
      tpu.vector_store %arg8[%c0_34, %c0_35], %68 {strides = array<i32>} : memref<8x128xf32, #tpu.memory_space<vmem>>, vector<8x128xf32>,
    } else {
    }
    return
  }
  func.func @transform_0(%arg0: i32, %arg1: i32) -> (i32, i32) {
    %c1_i32 = arith.constant 1 : i32
    %0 = arith.muli %arg0, %c1_i32 : i32
    %1 = arith.addi %0, %arg1 : i32
    %c0_i32 = arith.constant 0 : i32
    %c0_i32_0 = arith.constant 0 : i32
    return %1, %c0_i32 : i32, i32
  }
  func.func @transform_1(%arg0: i32, %arg1: i32) -> (i32, i32) {
    %c1_i32 = arith.constant 1 : i32
    %0 = arith.muli %arg0, %c1_i32 : i32
    %1 = arith.addi %0, %arg1 : i32
    %c0_i32 = arith.constant 0 : i32
    %c0_i32_0 = arith.constant 0 : i32
    return %1, %c0_i32 : i32, i32
  }
  func.func @transform_2(%arg0: i32, %arg1: i32) -> (i32, i32) {
    %c0_i32 = arith.constant 0 : i32
    %c0_i32_0 = arith.constant 0 : i32
    %c0_i32_1 = arith.constant 0 : i32
    return %c0_i32, %c0_i32_0 : i32, i32
  }
  func.func @transform_3(%arg0: i32, %arg1: i32) -> (i32, i32) {
    %c0_i32 = arith.constant 0 : i32
    %c0_i32_0 = arith.constant 0 : i32
    %c0_i32_1 = arith.constant 0 : i32
    return %c0_i32, %c0_i32_0 : i32, i32
  }
  func.func @transform_4(%arg0: i32, %arg1: i32) -> (i32, i32) {
    %c0_i32 = arith.constant 0 : i32
    %c0_i32_0 = arith.constant 0 : i32
    %c0_i32_1 = arith.constant 0 : i32
    return %c0_i32, %c0_i32_0 : i32, i32
  }
  func.func @transform_5(%arg0: i32, %arg1: i32) -> (i32, i32) {
    %c0_i32 = arith.constant 0 : i32
    %c0_i32_0 = arith.constant 0 : i32
    %c0_i32_1 = arith.constant 0 : i32
    return %c0_i32, %c0_i32_0 : i32, i32
  }
  func.func @transform_6(%arg0: i32, %arg1: i32) -> (i32, i32) {
    %c0_i32 = arith.constant 0 : i32
    %c0_i32_0 = arith.constant 0 : i32
    return %arg0, %c0_i32 : i32, i32
  }
}

</mosaic_0001>

<bundles_post_ra>
// kernel: tpu_custom_call.1
= control target key start
LH: loop header
LB: loop body
LE: loop exit
PB: predicated region body
PF: predicated region fallthrough
CT: control target
= control target key end

     0   :  { %vm83_vm0 = vcmask 261120   ;;  %s879_s0 = inlined_call_operand.vmem [shape: f32[48,32], index: 0, kind: input, shape index: {}]   ;;  %s880_s1 = inlined_call_operand.vmem [shape: f32[48,32], index: 1, kind: input, shape index: {}]   ;;  %s881_s2 = inlined_call_operand.vmem [shape: f32[32,32], index: 2, kind: input, shape index: {}]   ;;  %s882_s3 = inlined_call_operand.vmem [shape: f32[32,32], index: 3, kind: input, shape index: {}]   ;;  %s883_s4 = inlined_call_operand.vmem [shape: f32[1,32], index: 4, kind: input, shape index: {}]   ;;  %s884_s5 = inlined_call_operand.vmem [shape: f32[1,32], index: 5, kind: input, shape index: {}]   ;;  %s885_s6 = inlined_call_operand.hbm [shape: f32[8,128], index: 6, kind: output, shape index: {}]  }
   0x1   :  { %v82_v0 = vld [vmem:[%s881_s2 + $0x18] sm:$0xff]  ;;  %v81_v2 = vld [vmem:[%s881_s2 + $0x10] sm:$0xff]  ;;  %v80_v4 = vld [vmem:[%s881_s2 + $0x8] sm:$0xff] }
   0x2   :  { %v206_v1 = vld [vmem:[%s882_s3 + $0x18] sm:$0xff]  ;;  %632 = vmatprep.subr.mxu0 %v82_v0  ;;  %v205_v3 = vld [vmem:[%s882_s3 + $0x10] sm:$0xff]  ;;  %v204_v5 = vld [vmem:[%s882_s3 + $0x8] sm:$0xff] }
   0x3   :  { %649 = vmatprep.subr.mxu1 %v206_v1  ;;  %633 = vmatpush3.msra.mxu0 %v82_v0  ;;  %v79_v6 = vld [vmem:[%s881_s2] sm:$0xff] }
   0x4   :  { %650 = vmatpush3.msra.mxu1 %v206_v1  ;;  %634 = vmatprep.subr.mxu0 %v81_v2  ;;  %v203_v7 = vld [vmem:[%s882_s3] sm:$0xff] }
   0x5   :  { %651 = vmatprep.subr.mxu1 %v205_v3  ;;  %635 = vmatpush3.msra.mxu0 %v81_v2  ;;  %v73_v8 = vld [vmem:[%s879_s0] sm:$0xff] }
   0x6   :  { %652 = vmatpush3.msra.mxu1 %v205_v3  ;;  %636 = vmatprep.subr.mxu0 %v80_v4  ;;  %v197_v9 = vld [vmem:[%s880_s1] sm:$0xff] }
   0x7   :  { %653 = vmatprep.subr.mxu1 %v204_v5  ;;  %637 = vmatpush3.msra.mxu0 %v80_v4 }
   0x8   :  { %654 = vmatpush3.msra.mxu1 %v204_v5 }
   0x9   :  { %11 = vsyncpa [#allocation4], 0  ;;  %638 = vmatprep.subr.mxu0 %v79_v6  ;;  %655 = vmatprep.subr.mxu1 %v203_v7  ;;  %v74_v10 = vld [vmem:[%s879_s0 + $0x8] sm:$0xff]  ;;  %v75_v12 = vld [vmem:[%s879_s0 + $0x10] sm:$0xff]  ;;  %vm542_vm1 = vcmask 7168  }
   0xa   :  { %v198_v11 = vld [vmem:[%s880_s1 + $0x8] sm:$0xff]  ;;  %639 = vmatpush3.msra.mxu0 %v79_v6  ;;  %640 = vmatprep.mubr.msk.f32.mxu0 %vm83_vm0, %v73_v8  ;;  %v199_v13 = vld [vmem:[%s880_s1 + $0x10] sm:$0xff]  ;;  %v76_v14 = vld [vmem:[%s879_s0 + $0x18] sm:$0xff] }
   0xb   :  { %656 = vmatpush3.msra.mxu1 %v203_v7  ;;  %657 = vmatprep.mubr.msk.f32.mxu1 %vm83_vm0, %v197_v9  ;;  %v200_v15 = vld [vmem:[%s880_s1 + $0x18] sm:$0xff]  ;;  %v77_v16 = vld [vmem:[%s879_s0 + $0x20] sm:$0xff]  ;;  %v78_v18 = vld [vmem:[%s879_s0 + $0x28] sm:$0xff] }
   0xc   :  { %641 = vmatmul.mubr.msk.f32.vlgmr.msra.gmra.mxu0 %vm83_vm0, %v74_v10  ;;  %658 = vmatmul.mubr.msk.f32.vlgmr.msra.gmra.mxu1 %vm83_vm0, %v198_v11  ;;  %v201_v17 = vld [vmem:[%s880_s1 + $0x20] sm:$0xff]  ;;  %v202_v19 = vld [vmem:[%s880_s1 + $0x28] sm:$0xff]  ;;  %s715_s1 = smov [#allocation3]  }
   0xd   :  { %643 = vmatprep.mubr.msk.f32.mxu0 %vm83_vm0, %v75_v12  ;;  %660 = vmatprep.mubr.msk.f32.mxu1 %vm83_vm0, %v199_v13  ;;  %v611_v26 = vld [vmem:[%s884_s5] ss:$0 sm:$0xff] }
   0xe   :  { %v610_v28 = vld [vmem:[%s883_s4] ss:$0 sm:$0xff]  ;;  %s578_s4 = sshll.u32 %s715_s1, 4  ;;  %s579_s4 = int_to_ptr.vmem [resolvable:$true] %s578_s4 }
   0xf   :  { %s693_s14 = scalar_lea.vmem %s579_s4, 128  ;;  %p698_p1 = scmp.lt.s32.totalorder %s579_s4, %s579_s4 }
  0x10   :  { %644 = vmatmul.mubr.msk.f32.gmra.mxu0 %vm83_vm0, %v76_v14  ;;  %661 = vmatmul.mubr.msk.f32.gmra.mxu1 %vm83_vm0, %v200_v15  ;;  %p694_p0 = scmp.ne.s32.totalorder %s579_s4, %s693_s14  ;;  %p699_p2 = scmp.lt.s32.totalorder %s693_s14, %s693_s14 }
  0x11   :  { %646 = vmatprep.mubr.msk.f32.mxu0 %vm83_vm0, %v77_v16  ;;  %663 = vmatprep.mubr.msk.f32.mxu1 %vm83_vm0, %v201_v17 }
  0x12   :  { %p700_p3 = por %p699_p2, %p698_p1 }
  0x14   :  { %647 = vmatmul.mubr.msk.f32.gmra.mxu0 %vm83_vm0, %v78_v18  ;;  %664 = vmatmul.mubr.msk.f32.gmra.mxu1 %vm83_vm0, %v202_v19  ;;  %p701_p4 = pnand %p700_p3, %p694_p0 }
  0xcc   :  { %v642_v20 = vpop.f32.mrf.mxu0  ;;  %v659_v21 = vpop.f32.mrf.mxu1 }
  0xcd   :  { %v365_v22 = vsub.f32 0.0, %v659_v21  ;;  %v329_v25 = vsub.f32 0.0, %v642_v20  ;;  %v323_v51 = vmax.f32 %v642_v20, 0.0  ;;  %v359_v52 = vmax.f32 %v659_v21, 0.0 }
  0xce   :  { %v168_v23 = vpop.f32.mrf.mxu0  ;;  %v291_v24 = vpop.f32.mrf.mxu1 }
  0xcf   :  { %v328_v27 = vsub.f32 0.0, %v168_v23  ;;  %v364_v29 = vsub.f32 0.0, %v291_v24  ;;  %v377_v32 = vsub.f32 %v365_v22, %v611_v26  ;;  %v341_v37 = vsub.f32 %v329_v25, %v610_v28 }
  0xd0   :  { %v645_v30 = vpop.f32.mrf.mxu0  ;;  %v662_v31 = vpop.f32.mrf.mxu1  ;;  %v322_v53 = vmax.f32 %v168_v23, 0.0  ;;  %v358_v54 = vmax.f32 %v291_v24, 0.0 }
  0xd1   :  { %v376_v33 = vsub.f32 %v364_v29, %v611_v26  ;;  %v367_v34 = vsub.f32 0.0, %v662_v31  ;;  %v340_v38 = vsub.f32 %v328_v27, %v610_v28  ;;  %v331_v39 = vsub.f32 0.0, %v645_v30 }
  0xd2   :  { %v178_v35 = vpop.f32.mrf.mxu0  ;;  %v301_v36 = vpop.f32.mrf.mxu1  ;;  %v383_v44 = vmax.f32 %v377_v32, 0.0  ;;  %v347_v47 = vmax.f32 %v341_v37, 0.0  ;;  %v325_v56 = vmax.f32 %v645_v30, 0.0  ;;  %v361_v57 = vmax.f32 %v662_v31, 0.0 }
  0xd3   :  { %v330_v42 = vsub.f32 0.0, %v178_v35  ;;  %v366_v43 = vsub.f32 0.0, %v301_v36  ;;  %v382_v45 = vmax.f32 %v376_v33, 0.0  ;;  %v379_v46 = vsub.f32 %v367_v34, %v611_v26 }
  0xd4   :  { %v829_v40 = vpop.f32.mrf.mxu0  ;;  %v831_v41 = vpop.f32.mrf.mxu1  ;;  %v346_v48 = vmax.f32 %v340_v38, 0.0  ;;  %v343_v49 = vsub.f32 %v331_v39, %v610_v28  ;;  %v835_v63 = vsub.f32 %v359_v52, %v383_v44  ;;  %v353_v3 = vsub.f32 %v323_v51, %v347_v47 }
  0xd5   :  { %v342_v58 = vsub.f32 %v330_v42, %v610_v28  ;;  %v378_v59 = vsub.f32 %v366_v43, %v611_v26  ;;  %v833_v60 = vsub.f32 %v358_v54, %v382_v45  ;;  %v385_v61 = vmax.f32 %v379_v46, 0.0 }
  0xd6   :  { %v311_v50 = vpop.f32.mrf.mxu1  ;;  %v188_v55 = vpop.f32.mrf.mxu0  ;;  %v837_v0 = vsub.f32 %v322_v53, %v346_v48  ;;  %v349_v1 = vmax.f32 %v343_v49, 0.0  ;;  %v360_v4 = vmax.f32 %v301_v36, 0.0  ;;  %v333_v5 = vsub.f32 0.0, %v829_v40 }
  0xd7   :  { %v368_v62 = vsub.f32 0.0, %v311_v50  ;;  %v332_v2 = vsub.f32 0.0, %v188_v55  ;;  %v431_v6 = vmul.f32 %v835_v63, %v835_v63  ;;  %v348_v7 = vmax.f32 %v342_v58, 0.0 }
  0xd8   :  { %v384_v8 = vmax.f32 %v378_v59, 0.0  ;;  %v369_v9 = vsub.f32 0.0, %v831_v41  ;;  %v395_v10 = vmul.f32 %v353_v3, %v353_v3  ;;  %v391_v11 = vsub.f32 %v361_v57, %v385_v61 }
  0xd9   :  { %v380_v12 = vsub.f32 %v368_v62, %v611_v26  ;;  %v439_v13 = vsel %vm83_vm0, %v431_v6, 0.0  ;;  %v430_v14 = vmul.f32 %v833_v60, %v833_v60  ;;  %v355_v15 = vsub.f32 %v325_v56, %v349_v1 }
  0xda   :  { %v344_v16 = vsub.f32 %v332_v2, %v610_v28  ;;  %440 = vadd.xlane.f32.xlu1 %v439_v13  ;;  %v403_v17 = vsel %vm83_vm0, %v395_v10, 0.0  ;;  %v394_v18 = vmul.f32 %v837_v0, %v837_v0  ;;  %v324_v19 = vmax.f32 %v178_v35, 0.0 }
  0xdb   :  { %404 = vadd.xlane.f32.xlu0 %v403_v17  ;;  %v390_v20 = vsub.f32 %v360_v4, %v384_v8  ;;  %v345_v21 = vsub.f32 %v333_v5, %v610_v28  ;;  %v381_v22 = vsub.f32 %v369_v9, %v611_v26  ;;  %v326_v23 = vmax.f32 %v188_v55, 0.0 }
  0xdc   :  { %v362_v24 = vmax.f32 %v311_v50, 0.0  ;;  %v386_v25 = vmax.f32 %v380_v12, 0.0  ;;  %v436_v27 = vsel %vm83_vm0, %v430_v14, 0.0  ;;  %v433_v29 = vmul.f32 %v391_v11, %v391_v11 }
  0xdd   :  { %v354_v30 = vsub.f32 %v324_v19, %v348_v7  ;;  %v350_v31 = vmax.f32 %v344_v16, 0.0  ;;  %v400_v32 = vsel %vm83_vm0, %v394_v18, 0.0  ;;  %v397_v33 = vmul.f32 %v355_v15, %v355_v15 }
  0xde   :  { %437 = vadd.xlane.f32.xlu1 %v436_v27  ;;  %v327_v34 = vmax.f32 %v829_v40, 0.0  ;;  %v363_v35 = vmax.f32 %v831_v41, 0.0  ;;  %v387_v36 = vmax.f32 %v381_v22, 0.0  ;;  %v392_v28 = vsub.f32 %v362_v24, %v386_v25 }
  0xdf   :  { %401 = vadd.xlane.f32.xlu0 %v400_v32  ;;  %v445_v26 = vsel %vm83_vm0, %v433_v29, 0.0  ;;  %v432_v37 = vmul.f32 %v390_v20, %v390_v20  ;;  %v351_v38 = vmax.f32 %v345_v21, 0.0  ;;  %v356_v39 = vsub.f32 %v326_v23, %v350_v31 }
  0xe0   :  { %v409_v42 = vsel %vm83_vm0, %v397_v33, 0.0  ;;  %v396_v43 = vmul.f32 %v354_v30, %v354_v30  ;;  %v393_v44 = vsub.f32 %v363_v35, %v387_v36  ;;  %v434_v46 = vmul.f32 %v392_v28, %v392_v28 }
  0xe1   :  { %v442_v45 = vsel %vm83_vm0, %v432_v37, 0.0  ;;  %v357_v47 = vsub.f32 %v327_v34, %v351_v38  ;;  %v398_v41 = vmul.f32 %v356_v39, %v356_v39  ;;  %v467_v53 = vmul.f32 %v835_v63, %v353_v3 }
  0xe2   :  { %446 = vadd.xlane.f32.xlu1 %v445_v26  ;;  %v406_v40 = vsel %vm83_vm0, %v396_v43, 0.0  ;;  %v448_v48 = vsel %vm83_vm0, %v434_v46, 0.0  ;;  %v435_v49 = vmul.f32 %v393_v44, %v393_v44  ;;  %v466_v55 = vmul.f32 %v833_v60, %v837_v0 }
  0xe3   :  { %410 = vadd.xlane.f32.xlu0 %v409_v42  ;;  %v412_v50 = vsel %vm83_vm0, %v398_v41, 0.0  ;;  %v399_v51 = vmul.f32 %v357_v47, %v357_v47  ;;  %v475_v56 = vsel %vm83_vm0, %v467_v53, 0.0  ;;  %v469_v57 = vmul.f32 %v391_v11, %v355_v15 }
  0xe4   :  { %v451_v52 = vsel %vm83_vm0, %v435_v49, 0.0  ;;  %v472_v58 = vsel %vm83_vm0, %v466_v55, 0.0  ;;  %v468_v59 = vmul.f32 %v390_v20, %v354_v30  ;;  %v471_v62 = vmul.f32 %v393_v44, %v357_v47 }
  0xe5   :  { %v415_v54 = vsel %vm83_vm0, %v399_v51, 0.0  ;;  %v481_v61 = vsel %vm83_vm0, %v469_v57, 0.0  ;;  %v470_v1 = vmul.f32 %v392_v28, %v356_v39 }
  0xe6   :  { %443 = vadd.xlane.f32.xlu1 %v442_v45  ;;  %v478_v63 = vsel %vm83_vm0, %v468_v59, 0.0  ;;  %v487_v2 = vsel %vm83_vm0, %v471_v62, 0.0 }
  0xe7   :  { %407 = vadd.xlane.f32.xlu0 %v406_v40  ;;  %v484_v60 = vsel %vm83_vm0, %v470_v1, 0.0 }
  0xea   :  { %449 = vadd.xlane.f32.xlu1 %v448_v48 }
  0xeb   :  { %413 = vadd.xlane.f32.xlu0 %v412_v50 }
  0xee   :  { %452 = vadd.xlane.f32.xlu1 %v451_v52 }
  0xef   :  { %416 = vadd.xlane.f32.xlu0 %v415_v54 }
  0xf2   :  { %476 = vadd.xlane.f32.xlu1 %v475_v56 }
  0xf3   :  { %473 = vadd.xlane.f32.xlu0 %v472_v58 }
  0xf6   :  { %482 = vadd.xlane.f32.xlu1 %v481_v61 }
  0xf7   :  { %479 = vadd.xlane.f32.xlu0 %v478_v63 }
  0xfa   :  { %488 = vadd.xlane.f32.xlu1 %v487_v2 }
  0xfb   :  { %485 = vadd.xlane.f32.xlu0 %v484_v60 }
 0x163   :  { %v441_v0 = vpop.xlane.xlu1 %440 }
 0x164   :  { %v405_v3 = vpop.xlane.xlu0 %404  ;;  %669 = vrsqrt.f32 %v441_v0 }
 0x165   :  { %671 = vrsqrt.f32 %v405_v3 }
 0x167   :  { %v438_v4 = vpop.xlane.xlu1 %437 }
 0x168   :  { %673 = vrsqrt.f32 %v438_v4  ;;  %v402_v5 = vpop.xlane.xlu0 %401 }
 0x169   :  { %675 = vrsqrt.f32 %v402_v5 }
 0x16b   :  { %v447_v6 = vpop.xlane.xlu1 %446 }
 0x16c   :  { %677 = vrsqrt.f32 %v447_v6  ;;  %v411_v7 = vpop.xlane.xlu0 %410 }
 0x16d   :  { %679 = vrsqrt.f32 %v411_v7 }
 0x16f   :  { %v444_v8 = vpop.xlane.xlu1 %443 }
 0x170   :  { %681 = vrsqrt.f32 %v444_v8  ;;  %v408_v9 = vpop.xlane.xlu0 %407 }
 0x171   :  { %683 = vrsqrt.f32 %v408_v9  ;;  %v670_v10 = vpop.eup %669 }
 0x172   :  { %v672_v12 = vpop.eup %671  ;;  %v461_v16 = vmin.f32 %v670_v10, 1e+12 }
 0x173   :  { %v450_v11 = vpop.xlane.xlu1 %449  ;;  %v425_v17 = vmin.f32 %v672_v12, 1e+12 }
 0x174   :  { %685 = vrsqrt.f32 %v450_v11  ;;  %v414_v13 = vpop.xlane.xlu0 %413 }
 0x175   :  { %v674_v14 = vpop.eup %673  ;;  %687 = vrsqrt.f32 %v414_v13  ;;  %v525_v25 = vmul.f32 %v461_v16, %v425_v17 }
 0x176   :  { %v676_v15 = vpop.eup %675  ;;  %v460_v18 = vmin.f32 %v674_v14, 1e+12 }
 0x177   :  { %v424_v19 = vmin.f32 %v676_v15, 1e+12  ;;  %v453_v20 = vpop.xlane.xlu1 %452 }
 0x178   :  { %689 = vrsqrt.f32 %v453_v20  ;;  %v417_v21 = vpop.xlane.xlu0 %416 }
 0x179   :  { %v678_v22 = vpop.eup %677  ;;  %691 = vrsqrt.f32 %v417_v21  ;;  %v524_v27 = vmul.f32 %v460_v18, %v424_v19 }
 0x17a   :  { %v680_v23 = vpop.eup %679  ;;  %v463_v31 = vmin.f32 %v678_v22, 1e+12 }
 0x17b   :  { %v477_v24 = vpop.xlane.xlu1 %476  ;;  %v427_v32 = vmin.f32 %v680_v23, 1e+12 }
 0x17c   :  { %v474_v29 = vpop.xlane.xlu0 %473  ;;  %v537_v33 = vmul.f32 %v525_v25, %v477_v24 }
 0x17d   :  { %v682_v30 = vpop.eup %681  ;;  %v536_v34 = vmul.f32 %v524_v27, %v474_v29  ;;  %v527_v43 = vmul.f32 %v463_v31, %v427_v32 }
 0x17e   :  { %v684_v35 = vpop.eup %683  ;;  %v462_v36 = vmin.f32 %v682_v30, 1e+12  ;;  %v544_v39 = vsel %vm542_vm1, %v537_v33, 0.0 }
 0x17f   :  { %v426_v28 = vmin.f32 %v684_v35, 1e+12  ;;  %v483_v26 = vpop.xlane.xlu1 %482  ;;  %v543_v42 = vsel %vm542_vm1, %v536_v34, 0.0 }
 0x180   :  { %v480_v37 = vpop.xlane.xlu0 %479  ;;  %v539_v40 = vmul.f32 %v527_v43, %v483_v26  ;;  %v545_v48 = vadd.f32 %v544_v39, %v543_v42 }
 0x181   :  { %v686_v38 = vpop.eup %685  ;;  %v526_v44 = vmul.f32 %v462_v36, %v426_v28 }
 0x182   :  { %v688_v45 = vpop.eup %687  ;;  %v464_v46 = vmin.f32 %v686_v38, 1e+12  ;;  %v548_v57 = vsel %vm542_vm1, %v539_v40, 0.0 }
 0x183   :  { %v428_v47 = vmin.f32 %v688_v45, 1e+12  ;;  %v538_v41 = vmul.f32 %v526_v44, %v480_v37  ;;  %v489_v63 = vpop.xlane.xlu1 %488 }
 0x184   :  { %v486_v55 = vpop.xlane.xlu0 %485 }
 0x185   :  { %v690_v49 = vpop.eup %689  ;;  %v546_v50 = vsel %vm542_vm1, %v538_v41, 0.0  ;;  %v528_v51 = vmul.f32 %v464_v46, %v428_v47 }
 0x186   :  { %v692_v52 = vpop.eup %691  ;;  %v465_v53 = vmin.f32 %v690_v49, 1e+12  ;;  %v547_v54 = vadd.f32 %v546_v50, %v545_v48 }
 0x187   :  { %v429_v56 = vmin.f32 %v692_v52, 1e+12  ;;  %v540_v58 = vmul.f32 %v528_v51, %v486_v55 }
 0x188   :  { %v549_v59 = vadd.f32 %v548_v57, %v547_v54 }
 0x189   :  { %v529_v61 = vmul.f32 %v465_v53, %v429_v56  ;;  %v550_v62 = vsel %vm542_vm1, %v540_v58, 0.0 }
 0x18a   :  { %v551_v2 = vadd.f32 %v550_v62, %v549_v59 }
 0x18b   :  { %v541_v1 = vmul.f32 %v529_v61, %v489_v63 }
 0x18d   :  { %v552_v60 = vsel %vm542_vm1, %v541_v1, 0.0 }
 0x18e   :  { %v553_v0 = vadd.f32 %v552_v60, %v551_v2 }
 0x190   :  { %554 = vadd.xlane.f32.xlu0 %v553_v0 }
 0x219   :  { %v555_v3 = vpop.xlane.xlu0 %554 }
 0x21a   :  { %v556_v4 = vrot.slane %v555_v3, 4 }
 0x21c   :  { %v557_v5 = vadd.f32 %v556_v4, %v555_v3 }
 0x21e   :  { %v558_v6 = vrot.slane %v557_v5, 2 }
 0x220   :  { %v559_v7 = vadd.f32 %v558_v6, %v557_v5 }
 0x222   :  { %v560_v8 = vrot.slane %v559_v7, 1 }
 0x224   :  { %v561_v9 = vadd.f32 %v560_v8, %v559_v7 }
 0x226   :  { %666 = vpush %v561_v9 }
 0x257   :  { %s667_s5 = spop %666 }
 0x258   :  { %v564_v10 = vstv %s667_s5 }
 0x259   :  { %571 = vst [vmem:[#allocation3] sm:$0xff] %v564_v10 }
 0x25a   :  { %704 = shalt.err (!%p701_p4)
}
 0x25b   :  { %581 = dma.vmem_to_hbm [thread:$0]  %s579_s4, 128, %s885_s6, [#allocation4]  }
 0x25c   :  { %713 = dma.done.wait [#allocation4], 128  }
 0x25d   :  { %714 = vsyncadd [#allocation4], 4294967168 }
 0x25e   :  { %585 = vsyncpa [#allocation4], 1 }

</bundles_post_ra>
